<compile_context>
chip_gen: v7x
topology: tpu7x:2x2x1
jax: 0.10.0
libtpu: 0.0.40
codegen_flags: <defaults>
</compile_context>

<pallas_src>
import functools

import jax
import jax.numpy as jnp
from jax import lax
from jax.experimental import pallas as pl
from jax.experimental.pallas import tpu as pltpu

_NEG_BIG = -1e30  # masked-logit value: exp underflows to exactly 0


def _spatial_gather_kernel(logits_ref, feats_ref, out_ref,
                           m_ref, l_ref, acc_ref, *,
                           scale, n_total, mask_tail):
    # logits_ref: (1, K, TN)   feats_ref: (1, TC, TN)   out_ref: (1, K, TC)
    # m_ref/l_ref: (K, 1) f32  acc_ref: (K, TC) f32
    ni = pl.program_id(2)

    @pl.when(ni == 0)
    def _init():
        m_ref[...] = jnp.full_like(m_ref, -jnp.inf)
        l_ref[...] = jnp.zeros_like(l_ref)
        acc_ref[...] = jnp.zeros_like(acc_ref)

    s = logits_ref[0].astype(jnp.float32)                       # (K, TN)
    if scale != 1.0:                                            # static branch
        s = s * scale
    f = feats_ref[0]                                            # (TC, TN), native dtype

    if mask_tail:                                               # static branch
        # Ragged last spatial tile: block extends past N; OOB lanes hold
        # garbage.  Mask logits to -1e30 (softmax weight 0) and feats to 0
        # (avoid NaN * 0 on the MXU).  VPU selects hide under the feats DMA.
        tn = s.shape[-1]
        valid = n_total - ni * tn                               # traced scalar
        lane_k = lax.broadcasted_iota(jnp.int32, s.shape, 1)
        s = jnp.where(lane_k < valid, s, _NEG_BIG)
        lane_c = lax.broadcasted_iota(jnp.int32, f.shape, 1)
        f = jnp.where(lane_c < valid, f, jnp.zeros_like(f))

    # Online softmax statistics (running max / running sum).
    m_prev = m_ref[...]                                         # (K, 1)
    m_new = jnp.maximum(m_prev, jnp.max(s, axis=-1, keepdims=True))
    alpha = jnp.exp(m_prev - m_new)                             # (K, 1) rescale
    e = jnp.exp(s - m_new)                                      # (K, TN) un-normalized

    l_ref[...] = alpha * l_ref[...] + jnp.sum(e, axis=-1, keepdims=True)
    m_ref[...] = m_new

    # (K, TN) x (TC, TN) contracting on TN -> (K, TC); f32 accumulate on MXU.
    part = lax.dot_general(e.astype(f.dtype), f,
                           dimension_numbers=(((1,), (1,)), ((), ())),
                           preferred_element_type=jnp.float32)
    acc_ref[...] = acc_ref[...] * alpha + part                  # lane-dense rescale

    @pl.when(ni == pl.num_programs(2) - 1)
    def _finalize():
        # Deferred normalization: one (K, TC) multiply at the very end.
        inv_l = 1.0 / l_ref[...]                                # (K, 1), exact
        out_ref[0] = (acc_ref[...] * inv_l).astype(out_ref.dtype)


def _vmem_capacity_bytes():
    try:
        return int(pltpu.get_tpu_info().vmem_capacity_bytes)
    except Exception:
        return 64 << 20  # conservative fallback (v7x per-TensorCore VMEM)


def _multi_tensorcore_chip():
    # v7x has 2 TensorCores per chip sharded over "parallel" grid axes.
    try:
        kind = jax.devices()[0].device_kind.lower()
        return ("v7" in kind) or ("7x" in kind)
    except Exception:
        return False


def _pick_tc(C, B, tc_override):
    """Channel tile.  Must equal C, or be a multiple of 128 dividing C
    (so the lane-dense (K, TC) output block satisfies the (8,128) rule
    without any HBM-side padding of C)."""
    if tc_override is not None:
        tc = int(tc_override)
        if tc == C or (tc >= 128 and tc % 128 == 0 and C % tc == 0):
            return tc
        return C
    # Auto: single C tile (v5e/v6e: softmax bookkeeping done once per spatial
    # tile).  On a multi-TensorCore chip with B == 1, split C so both cores
    # get a parallel tile.
    if B == 1 and _multi_tensorcore_chip() and C % 256 == 0:
        return C // 2
    return C


def spatial_gather(feats, prev_logits, scale=1.0, *,
                   tn_target=None, tc_override=None, feats_in_bf16=False):
    """feats: (B, C, H, W), prev_logits: (B, K, H, W) -> (B, C, K, 1)."""
    assert scale > 0.0, "SpatialGatherModule requires scale > 0"
    B, C, H, W = feats.shape
    Bl, K, Hl, Wl = prev_logits.shape
    assert (B, H, W) == (Bl, Hl, Wl)
    N = H * W

    out_dtype = feats.dtype
    logits = prev_logits.reshape(B, K, N)        # (B, K, N)
    feats_f = feats.reshape(B, C, N)             # (B, C, N): no HBM transpose/pad
    if feats_in_bf16 and feats_f.dtype == jnp.float32:
        # Opt-in: halve the dominant HBM read; f32 accumulation is kept.
        feats_f = feats_f.astype(jnp.bfloat16)

    f_isz = jnp.dtype(feats_f.dtype).itemsize
    lg_isz = jnp.dtype(logits.dtype).itemsize
    o_isz = jnp.dtype(out_dtype).itemsize

    # ---- channel tile (sublane axis of feats, lane axis of output) ----
    TC = _pick_tc(C, B, tc_override)

    # ---- spatial (lane) tile: large, clamped by a generation-aware VMEM budget
    vmem_cap = _vmem_capacity_bytes()
    if tn_target is None:
        tn_target = 8192 if f_isz >= 4 else 16384
    tn_target = max(int(tn_target), 128)

    budget = max(vmem_cap - (8 << 20), 16 << 20)           # headroom for compiler
    fixed = 2 * K * TC * o_isz + (2 * K + K * TC) * 4      # out (dbl-buf) + scratch
    per_lane = 2 * K * lg_isz + 2 * TC * f_isz             # dbl-buffered inputs / lane
    tn_cap = max((budget - fixed) // per_lane, 128)
    TN = max((min(tn_target, int(tn_cap)) // 128) * 128, 128)

    if N <= TN:
        TN = N                                   # single spatial step, full dim
        grid_n = 1
    else:
        grid_n = -(-N // TN)
    mask_tail = (grid_n * TN != N)               # ragged tail handled in-kernel

    grid = (B, C // TC, grid_n)

    need = 2 * K * TN * lg_isz + 2 * TC * TN * f_isz + fixed
    vmem_limit = int(min(vmem_cap, max(need + (8 << 20), 32 << 20)))

    kernel = functools.partial(_spatial_gather_kernel,
                               scale=float(scale), n_total=N,
                               mask_tail=bool(mask_tail))

    out_kc = pl.pallas_call(
        kernel,
        out_shape=jax.ShapeDtypeStruct((B, K, C), out_dtype),
        grid_spec=pltpu.PrefetchScalarGridSpec(
            num_scalar_prefetch=0,
            grid=grid,
            in_specs=[
                pl.BlockSpec((1, K, TN), lambda b, ci, ni: (b, 0, ni)),
                # NOTE: pipeline_mode=pl.Buffered(3) on this streaming feats
                # read is a further option only if a trace still shows exposed
                # DMA after the large-TN change.
                pl.BlockSpec((1, TC, TN), lambda b, ci, ni: (b, ci, ni)),
            ],
            out_specs=pl.BlockSpec((1, K, TC), lambda b, ci, ni: (b, 0, ci)),
            scratch_shapes=[
                pltpu.VMEM((K, 1), jnp.float32),    # running max
                pltpu.VMEM((K, 1), jnp.float32),    # running sum
                pltpu.VMEM((K, TC), jnp.float32),   # context accumulator
            ],
        ),
        compiler_params=pltpu.CompilerParams(
            dimension_semantics=("parallel", "parallel", "arbitrary"),
            vmem_limit_bytes=vmem_limit),
    )(logits, feats_f)

    # (B, K, C) -> (B, C, K, 1): tiny wrapper-side transpose (B*K*C elements);
    # the kernel's store stays lane-dense.
    return jnp.transpose(out_kc, (0, 2, 1))[..., None]


def _reference(feats, prev_logits, scale=1.0):
    B, C, H, W = feats.shape
    K = prev_logits.shape[1]
    logits = prev_logits.reshape(B, K, -1).astype(jnp.float32)
    f = feats.reshape(B, C, -1)
    probs = jax.nn.softmax(scale * logits, axis=2)
    out = jnp.einsum("bkn,bcn->bck", probs, f)
    return out[..., None]                        # (B, C, K, 1)


if __name__ == "__main__":
    key = jax.random.PRNGKey(0)
    k1, k2, k3, k4, k5, k6 = jax.random.split(key, 6)

    # Case 1: multi-step online softmax (N tiled), f32, no ragged tail.
    B, C, K, H, W = 2, 32, 8, 16, 16
    feats = jax.random.normal(k1, (B, C, H, W), dtype=jnp.float32)
    prev_logits = jax.random.normal(k2, (B, K, H, W), dtype=jnp.float32)
    out = jax.block_until_ready(
        spatial_gather(feats, prev_logits, scale=1.0, tn_target=128))
    ref = _reference(feats, prev_logits, scale=1.0)
    assert out.shape == (B, C, K, 1), out.shape
    assert jnp.allclose(out, ref, atol=1e-5, rtol=1e-5), "mismatch (tiled N path)"

    # Case 2: ragged spatial size (in-kernel tail masking) + non-unit scale.
    B2, C2, K2, H2, W2 = 1, 24, 5, 13, 11
    feats2 = jax.random.normal(k3, (B2, C2, H2, W2), dtype=jnp.float32)
    logits2 = jax.random.normal(k4, (B2, K2, H2, W2), dtype=jnp.float32)
    out2 = jax.block_until_ready(
        spatial_gather(feats2, logits2, scale=0.5, tn_target=128))
    ref2 = _reference(feats2, logits2, scale=0.5)
    assert out2.shape == (B2, C2, K2, 1), out2.shape
    assert jnp.allclose(out2, ref2, atol=1e-5, rtol=1e-5), "mismatch (ragged path)"

    # Case 3: channel tiling (TC < C) with lane-dense (K, TC) output blocks.
    B3, C3, K3, H3, W3 = 1, 256, 5, 8, 8
    feats3 = jax.random.normal(k5, (B3, C3, H3, W3), dtype=jnp.float32)
    logits3 = jax.random.normal(k6, (B3, K3, H3, W3), dtype=jnp.float32)
    out3 = jax.block_until_ready(
        spatial_gather(feats3, logits3, scale=2.0, tc_override=128))
    ref3 = _reference(feats3, logits3, scale=2.0)
    assert out3.shape == (B3, C3, K3, 1), out3.shape
    assert jnp.allclose(out3, ref3, atol=1e-5, rtol=1e-5), "mismatch (C-tiled path)"

    # Case 4: opt-in bf16 feats streaming (f32 accumulation), looser tolerance.
    out4 = jax.block_until_ready(
        spatial_gather(feats, prev_logits, scale=1.0, feats_in_bf16=True))
    ref4 = _reference(feats.astype(jnp.bfloat16).astype(jnp.float32),
                      prev_logits, scale=1.0)
    assert jnp.allclose(out4, ref4, atol=2e-2, rtol=2e-2), "mismatch (bf16 path)"

    print("KERNEL_OK")
</pallas_src>

<mosaic_0001>
module attributes {stable_mosaic.version = 11 : i64} {
  func.func @_spatial_gather_kernel(%arg0: i32, %arg1: i32, %arg2: i32, %arg3: memref<1x8x128xf32, #tpu.memory_space<vmem>>, %arg4: memref<1x32x128xf32, #tpu.memory_space<vmem>>, %arg5: memref<1x8x32xf32, #tpu.memory_space<vmem>>, %arg6: memref<8x1xf32, #tpu.memory_space<vmem>>, %arg7: memref<8x1xf32, #tpu.memory_space<vmem>>, %arg8: memref<8x32xf32, #tpu.memory_space<vmem>>) attributes {dimension_semantics = [#tpu.dimension_semantics<parallel>, #tpu.dimension_semantics<parallel>, #tpu.dimension_semantics<arbitrary>], iteration_bounds = array<i64: 2, 1, 2>, scalar_prefetch = 0 : i64, scratch_operands = 3 : i64, tpu.core_type = #tpu.core_type<tc>, window_params = [{transform_indices = @transform_0, window_bounds = array<i64: 1, 8, 128>}, {transform_indices = @transform_1, window_bounds = array<i64: 1, 32, 128>}, {transform_indices = @transform_2, window_bounds = array<i64: 1, 8, 32>}]} {
    %c0_i32 = arith.constant 0 : i32
    %0 = arith.cmpi eq, %arg2, %c0_i32 : i32
    %1 = arith.extui %0 : i1 to i32
    %c0_i32_0 = arith.constant 0 : i32
    %2 = arith.cmpi ne, %1, %c0_i32_0 : i32
    scf.if %2 {
      %cst_21 = arith.constant 0xFF800000 : f32
      %32 = vector.broadcast %cst_21 : f32 to vector<8x1xf32>
      %c0_22 = arith.constant 0 : index
      %c0_23 = arith.constant 0 : index
      %33 = vector.load %arg6[%c0_22, %c0_23] : memref<8x1xf32, #tpu.memory_space<vmem>>, vector<8x1xf32>
      tpu.vector_store %arg6[%c0_22, %c0_23], %32 {strides = array<i32>} : memref<8x1xf32, #tpu.memory_space<vmem>>, vector<8x1xf32>,
      %cst_24 = arith.constant 0.000000e+00 : f32
      %34 = vector.broadcast %cst_24 : f32 to vector<8x1xf32>
      %c0_25 = arith.constant 0 : index
      %c0_26 = arith.constant 0 : index
      %35 = vector.load %arg7[%c0_25, %c0_26] : memref<8x1xf32, #tpu.memory_space<vmem>>, vector<8x1xf32>
      tpu.vector_store %arg7[%c0_25, %c0_26], %34 {strides = array<i32>} : memref<8x1xf32, #tpu.memory_space<vmem>>, vector<8x1xf32>,
      %cst_27 = arith.constant 0.000000e+00 : f32
      %36 = vector.broadcast %cst_27 : f32 to vector<8x32xf32>
      %c0_28 = arith.constant 0 : index
      %c0_29 = arith.constant 0 : index
      %37 = vector.load %arg8[%c0_28, %c0_29] : memref<8x32xf32, #tpu.memory_space<vmem>>, vector<8x32xf32>
      tpu.vector_store %arg8[%c0_28, %c0_29], %36 {strides = array<i32>} : memref<8x32xf32, #tpu.memory_space<vmem>>, vector<8x32xf32>,
    } else {
    }
    %c0 = arith.constant 0 : index
    %c0_1 = arith.constant 0 : index
    %c0_2 = arith.constant 0 : index
    %3 = vector.load %arg3[%c0, %c0_1, %c0_2] : memref<1x8x128xf32, #tpu.memory_space<vmem>>, vector<1x8x128xf32>
    %4 = vector.shape_cast %3 : vector<1x8x128xf32> to vector<8x128xf32>
    %c0_3 = arith.constant 0 : index
    %c0_4 = arith.constant 0 : index
    %c0_5 = arith.constant 0 : index
    %5 = vector.load %arg4[%c0_3, %c0_4, %c0_5] : memref<1x32x128xf32, #tpu.memory_space<vmem>>, vector<1x32x128xf32>
    %6 = vector.shape_cast %5 : vector<1x32x128xf32> to vector<32x128xf32>
    %c0_6 = arith.constant 0 : index
    %c0_7 = arith.constant 0 : index
    %7 = vector.load %arg6[%c0_6, %c0_7] : memref<8x1xf32, #tpu.memory_space<vmem>>, vector<8x1xf32>
    %cst = arith.constant dense<0xFF800000> : vector<8xf32>
    %8 = vector.multi_reduction <maximumf>, %4, %cst [1] : vector<8x128xf32> to vector<8xf32>
    %9 = vector.shape_cast %8 : vector<8xf32> to vector<8x1xf32>
    %10 = arith.maximumf %7, %9 : vector<8x1xf32>
    %11 = arith.subf %7, %10 : vector<8x1xf32>
    %12 = math.exp %11 : vector<8x1xf32>
    %13 = vector.broadcast %10 : vector<8x1xf32> to vector<8x128xf32>
    %14 = arith.subf %4, %13 : vector<8x128xf32>
    %15 = math.exp %14 : vector<8x128xf32>
    %c0_8 = arith.constant 0 : index
    %c0_9 = arith.constant 0 : index
    %16 = vector.load %arg7[%c0_8, %c0_9] : memref<8x1xf32, #tpu.memory_space<vmem>>, vector<8x1xf32>
    %17 = arith.mulf %12, %16 : vector<8x1xf32>
    %cst_10 = arith.constant dense<0.000000e+00> : vector<8xf32>
    %18 = vector.multi_reduction <add>, %15, %cst_10 [1] : vector<8x128xf32> to vector<8xf32>
    %19 = vector.shape_cast %18 : vector<8xf32> to vector<8x1xf32>
    %20 = arith.addf %17, %19 : vector<8x1xf32>
    %c0_11 = arith.constant 0 : index
    %c0_12 = arith.constant 0 : index
    %21 = vector.load %arg7[%c0_11, %c0_12] : memref<8x1xf32, #tpu.memory_space<vmem>>, vector<8x1xf32>
    tpu.vector_store %arg7[%c0_11, %c0_12], %20 {strides = array<i32>} : memref<8x1xf32, #tpu.memory_space<vmem>>, vector<8x1xf32>,
    %c0_13 = arith.constant 0 : index
    %c0_14 = arith.constant 0 : index
    %22 = vector.load %arg6[%c0_13, %c0_14] : memref<8x1xf32, #tpu.memory_space<vmem>>, vector<8x1xf32>
    tpu.vector_store %arg6[%c0_13, %c0_14], %10 {strides = array<i32>} : memref<8x1xf32, #tpu.memory_space<vmem>>, vector<8x1xf32>,
    %cst_15 = arith.constant dense<0.000000e+00> : vector<8x32xf32>
    %23 = tpu.matmul %15, %6, %cst_15 {dimension_numbers = #tpu.dot_dimension_numbers<[1], [1], [0], [0], [0, 0, 1, 0], [], []>} : vector<8x128xf32>, vector<32x128xf32>, vector<8x32xf32> -> vector<8x32xf32>
    %c0_16 = arith.constant 0 : index
    %c0_17 = arith.constant 0 : index
    %24 = vector.load %arg8[%c0_16, %c0_17] : memref<8x32xf32, #tpu.memory_space<vmem>>, vector<8x32xf32>
    %25 = vector.broadcast %12 : vector<8x1xf32> to vector<8x32xf32>
    %26 = arith.mulf %24, %25 : vector<8x32xf32>
    %27 = arith.addf %26, %23 : vector<8x32xf32>
    %c0_18 = arith.constant 0 : index
    %c0_19 = arith.constant 0 : index
    %28 = vector.load %arg8[%c0_18, %c0_19] : memref<8x32xf32, #tpu.memory_space<vmem>>, vector<8x32xf32>
    tpu.vector_store %arg8[%c0_18, %c0_19], %27 {strides = array<i32>} : memref<8x32xf32, #tpu.memory_space<vmem>>, vector<8x32xf32>,
    %c1_i32 = arith.constant 1 : i32
    %29 = arith.cmpi eq, %arg2, %c1_i32 : i32
    %30 = arith.extui %29 : i1 to i32
    %c0_i32_20 = arith.constant 0 : i32
    %31 = arith.cmpi ne, %30, %c0_i32_20 : i32
    scf.if %31 {
      %c0_21 = arith.constant 0 : index
      %c0_22 = arith.constant 0 : index
      %32 = vector.load %arg7[%c0_21, %c0_22] : memref<8x1xf32, #tpu.memory_space<vmem>>, vector<8x1xf32>
      %cst_23 = arith.constant 1.000000e+00 : f32
      %33 = vector.broadcast %cst_23 : f32 to vector<8x1xf32>
      %34 = arith.divf %33, %32 : vector<8x1xf32>
      %c0_24 = arith.constant 0 : index
      %c0_25 = arith.constant 0 : index
      %35 = vector.load %arg8[%c0_24, %c0_25] : memref<8x32xf32, #tpu.memory_space<vmem>>, vector<8x32xf32>
      %36 = vector.broadcast %34 : vector<8x1xf32> to vector<8x32xf32>
      %37 = arith.mulf %35, %36 : vector<8x32xf32>
      %c0_26 = arith.constant 0 : index
      %c0_27 = arith.constant 0 : index
      %c0_28 = arith.constant 0 : index
      %38 = vector.load %arg5[%c0_26, %c0_27, %c0_28] : memref<1x8x32xf32, #tpu.memory_space<vmem>>, vector<1x8x32xf32>
      %39 = vector.shape_cast %38 : vector<1x8x32xf32> to vector<8x32xf32>
      %40 = vector.shape_cast %37 : vector<8x32xf32> to vector<1x8x32xf32>
      tpu.vector_store %arg5[%c0_26, %c0_27, %c0_28], %40 {strides = array<i32>} : memref<1x8x32xf32, #tpu.memory_space<vmem>>, vector<1x8x32xf32>,
    } else {
    }
    return
  }
  func.func @transform_0(%arg0: i32, %arg1: i32, %arg2: i32) -> (i32, i32, i32) {
    %c0_i32 = arith.constant 0 : i32
    %c0_i32_0 = arith.constant 0 : i32
    return %arg0, %c0_i32, %arg2 : i32, i32, i32
  }
  func.func @transform_1(%arg0: i32, %arg1: i32, %arg2: i32) -> (i32, i32, i32) {
    %c0_i32 = arith.constant 0 : i32
    return %arg0, %arg1, %arg2 : i32, i32, i32
  }
  func.func @transform_2(%arg0: i32, %arg1: i32, %arg2: i32) -> (i32, i32, i32) {
    %c0_i32 = arith.constant 0 : i32
    %c0_i32_0 = arith.constant 0 : i32
    return %arg0, %c0_i32, %arg1 : i32, i32, i32
  }
}

</mosaic_0001>

<bundles_post_ra>
// kernel: tpu_custom_call.1
= control target key start
LH: loop header
LB: loop body
LE: loop exit
PB: predicated region body
PF: predicated region fallthrough
CT: control target
= control target key end

     0   :  { %s1159_s0 = inlined_call_operand.hbm [shape: f32[2,8,256], index: 0, kind: input, shape index: {}]   ;;  %s1160_s1 = inlined_call_operand.hbm [shape: f32[2,32,256], index: 1, kind: input, shape index: {}]   ;;  %s1161_s2 = inlined_call_operand.hbm [shape: f32[2,8,32], index: 2, kind: output, shape index: {}]  }
   0x1   :  { %1166 = sst [smem:[#allocation17_spill]] %s1159_s0 }
   0x2   :  { %7 = vsyncpa [#allocation6], 0 }
   0x3   :  { %9 = vsyncpa [#allocation6 + $0x1], 0 }
   0x4   :  { %10 = vsyncpa [#allocation9], 0 }
   0x5   :  { %12 = vsyncpa [#allocation9 + $0x1], 0 }
   0x6   :  { %13 = vsyncpa [#allocation7], 0 }
   0x7   :  { %15 = vsyncpa [#allocation7 + $0x1], 0  ;;  %s878_s9 = smov 0   ;;  %s880_s10 = smov 0  }
   0x8   :  { %s882_s11 = smov 0   ;;  %s884_s12 = smov 0  }
   0x9   :  { %s886_s13 = smov 0   ;;  %s888_s14 = smov 0  }
   0xa   :  { %s890_s15 = smov 0   ;;  %s892_s16 = smov 0  }
   0xb   :  { %s894_s17 = smov 0   ;;  %s896_s18 = smov 0  }
   0xc   :  { %s898_s19 = smov 0  }
   0xd LB: > { %s494_s20 = sadd.s32 4294967295, %s848_s19   ;;  %s495_s21 = sadd.s32 4294967294, %s848_s19   ;;  %s848_s19 = sphi %s898_s19, %s21_s19   ;;  %s844_s18 = sphi %s896_s18, %s1193_s18   ;;  %s840_s17 = sphi %s894_s17, %s1192_s17   ;;  %s836_s16 = sphi %s892_s16, %s1191_s16   ;;  %s832_s15 = sphi %s890_s15, %s1190_s15   ;;  %s828_s14 = sphi %s888_s14, %s1189_s14   ;;  %s824_s13 = sphi %s886_s13, %s1188_s13   ;;  %s820_s12 = sphi %s884_s12, %s1187_s12   ;;  %s816_s11 = sphi %s882_s11, %s1186_s11   ;;  %s812_s10 = sphi %s880_s10, %s1185_s10   ;;  %s808_s9 = sphi %s878_s9, %s1184_s9  }
   0xe   : > { %s33_s22 = sadd.s32 1, %s840_s17  ;;  %s40_s23 = sadd.s32 1, %s844_s18 }
   0xf   : > { %p34_p0 = scmp.ge.s32.totalorder %s33_s22, 2  ;;  %s49_s24 = sadd.s32 1, %s828_s14 }
  0x10   : > { %p56_p1 = scmp.ne.s32.totalorder %s828_s14, %s824_s13  ;;  %p57_p2 = scmp.eq.s32.totalorder %s848_s19, 0 }
  0x11   : > { %s1195_s22 = smov (%p34_p0, %s33_s22), 0  ;;  %s1197_s23 = smov (!%p34_p0, %s40_s23), %s844_s18 }
  0x12   : > { %1167 = sst [smem:[#allocation14_spill]] %s1195_s22  ;;  %s45_s25 = ssub.s32 %s840_s17, %s1195_s22 }
  0x13   : > { %p944_p3 = por %p57_p2, %p56_p1  ;;  %p42_p4 = scmp.ge.s32.totalorder %s1197_s23, 2 }
  0x14   : > { %p62_p5 = scmp.ne.s32.totalorder %s824_s13, %s820_s12  ;;  %p63_p6 = scmp.eq.s32.totalorder %s494_s20, 0 }
  0x15   : > { %s107_s27 = sadd.s32 1, %s816_s11  ;;  %s1199_s23 = smov (%p42_p4, %s1197_s23), 0 }
  0x16   : > { %1169 = sst [smem:[#allocation15_spill]] %s1199_s23  ;;  %p952_p7 = por %p63_p6, %p62_p5 }
  0x17   : > { %p117_p8 = scmp.ne.s32.totalorder %s816_s11, %s812_s10  ;;  %s44_s29 = ssub.s32 %s844_s18, %s1199_s23 }
  0x18   : > { %s1170_s28 = scalar_select %p952_p7, 1, 0 }
  0x19   : > { %p118_p9 = scmp.eq.s32.totalorder %s494_s20, 3  ;;  %s46_s30 = sor.u32 %s45_s25, %s44_s29 }
  0x1a   : > { %p105_p10 = scmp.eq.s32.totalorder %s44_s29, 0  ;;  %p47_p11 = scmp.eq.s32.totalorder %s46_s30, 0 }
  0x1b   : > { %p960_p12 = por %p118_p9, %p117_p8  ;;  %p123_p13 = scmp.ne.s32.totalorder %s812_s10, %s808_s9 }
  0x1c   : > { %s965_s4 = scalar_select %p105_p10, %s816_s11, %s107_s27  }
  0x1d   : > { %s1171_s3 = scalar_select %p960_p12, 1, 0 }
  0x1e   : > { %s968_s5 = scalar_select %p47_p11, %s828_s14, %s49_s24  }
  0x1f   : > { %p124_p0 = scmp.eq.s32.totalorder %s495_s21, 3  ;;  %p553_p1 = scmp.lt.s32.totalorder %s848_s19, 4 }
  0x20   : > { %1172 = sst [smem:[#allocation16_spill]] %s968_s5  ;;  %s978_s7 = sand.u32 1, %s828_s14  }
  0x21   : > { %p973_p2 = por %p124_p0, %p123_p13  ;;  %s498_s8 = sshll.u32 %s978_s7, 3 }
  0x22   : > { %s499_s12 = sshll.u32 %s844_s18, 1  ;;  %s148_s25 = scalar_lea.vmem [#allocation5], %s498_s8 }
  0x23   : > { %s1173_s6 = scalar_select %p973_p2, 1, 0 }
  0x24   : > { %s153_s20 = sadd.s32 %s840_s17, %s499_s12  ;;  %s157_s27 = sshll.u32 %s148_s25, 4  ;;  %s983_s27 = int_to_ptr.vmem [resolvable:$true] %s157_s27 }
  0x25   : > { %s500_s29 = sshll.u32 %s153_s20, 7  ;;  %s1174_s0 = sld [smem:[#allocation17_spill]] }
  0x26   : > { %p992_p4 = pnand %p553_p1, %p944_p3  ;;  %s145_s12 = scalar_lea.sflag [#allocation6], %s978_s7 }
  0x28   : > { %p664_p6 = pneg %p992_p4 }
  0x2b   : > { %s988_s30 = scalar_lea.hbm %s1174_s0, %s500_s29  ;;  %s667_s29 = scalar_lea.hbm %s1174_s0, 512 }
  0x2c   : > { %s662_s20 = scalar_lea.hbm %s988_s30, 128  ;;  %p668_p3 = scmp.lt.u32.totalorder %s988_s30, %s1174_s0 }
  0x2d   : > { %p663_p5 = scmp.ne.s32.totalorder %s988_s30, %s662_s20  ;;  %p669_p10 = scmp.lt.u32.totalorder %s667_s29, %s662_s20 }
  0x2e   : > { %p671_p13 = scmp.lt.u32.totalorder %s662_s20, %s988_s30 }
  0x2f   : > { %p665_p8 = pnand %p664_p6, %p663_p5  ;;  %p670_p11 = por %p669_p10, %p668_p3 }
  0x31   : > { %p666_p9 = pneg %p665_p8  ;;  %p672_p0 = por %p671_p13, %p670_p11 }
  0x33   : > { %p673_p1 = pnand %p672_p0, %p666_p9 }
  0x35   : > { %676 = shalt.err (!%p673_p1)
}
  0x36   : > { %s677_s8 = scalar_lea.vmem %s983_s27, 128  ;;  %s850_s26 = smov [#allocation5]  }
  0x37   : > { %p678_p5 = scmp.ne.s32.totalorder %s983_s27, %s677_s8  ;;  %s682_s25 = sshll.u32 %s850_s26, 4  ;;  %s683_s25 = int_to_ptr.vmem [resolvable:$false] %s682_s25 }
  0x38   : > { %s684_s24 = scalar_lea.vmem %s683_s25, 256  ;;  %p685_p12 = scmp.lt.s32.totalorder %s983_s27, %s683_s25 }
  0x39   : > { %p680_p8 = pnand %p678_p5, %p664_p6  ;;  %p686_p3 = scmp.lt.s32.totalorder %s684_s24, %s677_s8 }
  0x3b   : > { %p681_p2 = pneg %p680_p8  ;;  %p687_p10 = por %p686_p3, %p685_p12 }
  0x3d   : > { %p688_p11 = pnand %p687_p10, %p681_p2 }
  0x3f   : > { %691 = shalt.err (!%p688_p11)
}
  0x40   : > { %545 = dma.hbm_to_vmem [thread:$0]  (!%p992_p4), %s988_s30, 128, %s983_s27, %s145_s12  }
  0x41   : > { %s502_s20 = sshll.u32 %s844_s18, 3  ;;  %p504_p9 = scmp.ge.s32.totalorder %s848_s19, 1 }
  0x42   : > { %s176_s29 = sadd.s32 %s840_s17, %s502_s20  ;;  %p187_p13 = scmp.lt.s32.totalorder %s848_s19, 5 }
  0x43   : > { %s503_s8 = sshll.u32 %s176_s29, 7  ;;  %s1176_s21 = sshll.u32 %s978_s7, 5 }
  0x44   : > { %s168_s26 = scalar_lea.vmem [#allocation8], %s1176_s21  ;;  %p1029_p12 = pnand %p504_p9, %p187_p13 }
  0x45   : > { %s179_s25 = sshll.u32 %s168_s26, 4  ;;  %s1036_s5 = scalar_lea.hbm %s1160_s1, %s503_s8  ;;  %s1038_s25 = int_to_ptr.vmem [resolvable:$true] %s179_s25 }
  0x46   : > { %s165_s27 = scalar_lea.sflag [#allocation9], %s978_s7  ;;  %s692_s30 = scalar_lea.hbm %s1036_s5, 512 }
  0x47   : > { %p693_p2 = scmp.ne.s32.totalorder %s1036_s5, %s692_s30  ;;  %s697_s29 = scalar_lea.hbm %s1160_s1, 2048 }
  0x48   : > { %p698_p5 = scmp.lt.u32.totalorder %s1036_s5, %s1160_s1  ;;  %p699_p8 = scmp.lt.u32.totalorder %s697_s29, %s692_s30 }
  0x49   : > { %p695_p0 = pnand %p693_p2, %p664_p6  ;;  %p701_p10 = scmp.lt.u32.totalorder %s692_s30, %s1036_s5 }
  0x4a   : > { %p700_p3 = por %p699_p8, %p698_p5 }
  0x4b   : > { %p696_p1 = pneg %p695_p0 }
  0x4c   : > { %p702_p11 = por %p701_p10, %p700_p3 }
  0x4e   : > { %p703_p9 = pnand %p702_p11, %p696_p1 }
  0x50   : > { %706 = shalt.err (!%p703_p9)
}
  0x51   : > { %s707_s8 = scalar_lea.vmem %s1038_s25, 512  ;;  %s851_s21 = smov [#allocation8]  }
  0x52   : > { %p708_p13 = scmp.ne.s32.totalorder %s1038_s25, %s707_s8  ;;  %s712_s26 = sshll.u32 %s851_s21, 4  ;;  %s713_s26 = int_to_ptr.vmem [resolvable:$false] %s712_s26 }
  0x53   : > { %s714_s12 = scalar_lea.vmem %s713_s26, 1024  ;;  %p715_p7 = scmp.lt.s32.totalorder %s1038_s25, %s713_s26 }
  0x54   : > { %p710_p2 = pnand %p708_p13, %p664_p6  ;;  %p716_p5 = scmp.lt.s32.totalorder %s714_s12, %s707_s8 }
  0x56   : > { %p711_p0 = pneg %p710_p2  ;;  %p717_p8 = por %p716_p5, %p715_p7 }
  0x58   : > { %p718_p3 = pnand %p717_p8, %p711_p0 }
  0x5a   : > { %721 = shalt.err (!%p718_p3)
}
  0x5b   : > { %s852_s30 = smov 256   ;;  %s853_s20 = smov 128  }
  0x5c   : > { %s854_s29 = smov 8   ;;  %191 = sbr.rel (%p1029_p12) target bundleno = 719 (0x2cf), region = 28 }
  0x5d   : > { %548 = dma.hbm_to_vmem [thread:$0]  (!%p992_p4), %s1036_s5, 512, %s1038_s25, %s165_s27, %s852_s30, %s853_s20, %s854_s29  }
  0x5e   : > { %s193_s0 = sand.u32 (!%p1029_p12), 1, %s824_s13   ;;  %p1178_p7 = scmp.ne.s32.totalorder (!%p1029_p12), %s1170_s28, 0 }
  0x5f   : > { %s505_s22 = sshll.u32 (!%p1029_p12), %s193_s0, 3  ;;  %s194_s8 = scalar_lea.sflag (!%p1029_p12), [#allocation6], %s193_s0 }
  0x60   : > { %s197_s21 = scalar_lea.vmem (!%p1029_p12), [#allocation5], %s505_s22 }
  0x63   : > { %795 = dma.done.wait (%p1178_p7), %s194_s8, 128  }
  0x64   : > { %797 = vsyncadd (%p1178_p7), %s194_s8, 4294967168  ;;  %s506_s26 = sshll.u32 %s193_s0, 5  ;;  %s203_s12 = scalar_lea.sflag [#allocation9], %s193_s0 }
  0x65   : > { %s1073_s23 = scalar_lea.vmem [#allocation8], %s506_s26 }
  0x66   : > { %799 = dma.done.wait (%p1178_p7), %s203_s12, 512  }
  0x67   : > { %801 = vsyncadd (%p1178_p7), %s203_s12, 4294966784  ;;  %s229_s5 = sand.u32 1, %s812_s10   ;;  %p508_p4 = scmp.ne.s32.totalorder %s832_s15, 0 }
  0x68   : > { %s1082_s7 = sshll.u32 %s229_s5, 3  ;;  %vm237_vm0 = vcmask (!%p508_p4), 7168   ;;  %vm240_vm1 = vcmask (!%p508_p4), 261120   ;;  %v855_v0 = vmov (!%p508_p4), -inf   ;;  %v856_v1 = vmov (!%p508_p4), 0.0  }
  0x69   : > { %s231_s25 = scalar_lea.vmem [#allocation10], %s1082_s7  ;;  %236 = sbr.rel (%p508_p4) target bundleno = 112 (0x70), region = 40  ;;  %238 = vst.msk [vmem:[#allocation2] sm:$0xff] (!%p508_p4), %vm237_vm0, %v855_v0  ;;  %239 = vst.msk [vmem:[#allocation3] sm:$0xff] (!%p508_p4), %vm237_vm0, %v856_v1 }
  0x6a   : > { %241 = vst.msk [vmem:[#allocation4] sm:$0xff] (!%p508_p4), %vm240_vm1, %v856_v1 }
  0x70 PF: > { %v242_v2 = vld [vmem:[%s197_s21] sm:$0xff]  ;;  %v857_v3 = vmov 0   ;;  %v858_v4 = vmov 0.0|0.0   ;;  %vm267_vm2 = vcmask 7168   ;;  %v243_v7 = vld [vmem:[%s1073_s23] sm:$0xff]  ;;  %v244_v8 = vld [vmem:[%s1073_s23 + $0x8] sm:$0xff] }
  0x71   : > { %248 = vmax.xlane.f32.xlu0 %v242_v2  ;;  %654 = vset.pattern.permute.xlu1 %v857_v3  ;;  %v247_v5 = vld [vmem:[#allocation2] sm:$0xff]  ;;  %v531_v10 = vpack.c.bf16 %v244_v8, %v243_v7  ;;  %v245_v12 = vld [vmem:[%s1073_s23 + $0x10] sm:$0xff]  ;;  %vm859_vm3 = vmmov 0   ;;  %v860_v15 = vmov 0.0   ;;  %v262_v22 = vld [vmem:[#allocation3] sm:$0xff]  ;;  %vm348_vm4 = vcmask 261120  }
  0x72   : > { %653 = vset.pattern.permute.xlu0 %v857_v3  ;;  %530 = vmatprep.subr.bf16.mxu0 %v858_v4  ;;  %v246_v13 = vld [vmem:[%s1073_s23 + $0x18] sm:$0xff]  ;;  %v340_v26 = vld [vmem:[#allocation4] sm:$0xff]  ;;  %p509_p6 = scmp.ne.s32.totalorder %s832_s15, 1 }
  0x73   : > { %532 = vmatpush3.bf16.xpose.msra.mxu0 %v531_v10  ;;  %v534_v14 = vpack.c.bf16 %v246_v13, %v245_v12  ;;  %527 = vmatprep.mubr.msk.f32.mxu0 %vm859_vm3, %v860_v15  ;;  %v861_v33 = vmov (!%p509_p6), 0  }
  0x74   : > { %533 = vmatprep.subr.bf16.mxu0 %v858_v4 }
  0x7b   : > { %535 = vmatpush3.bf16.xpose.msra.mxu0 %v534_v14 }
  0xfe   : > { %v249_v6 = vpop.xlane.xlu0 %248 }
  0xff   : > { %v250_v9 = vmax.f32 %v247_v5, %v249_v6 }
 0x101   : > { %v251_v11 = vsub.f32 %v247_v5, %v250_v9  ;;  %269 = vst.msk [vmem:[#allocation2] sm:$0xff] %vm267_vm2, %v250_v9  ;;  %256 = vperm.xlu0 %653, %v250_v9  }
 0x103   : > { %v252_v20 = vmul.f32 1.442695, %v251_v11 }
 0x105   : > { %659 = vset.pattern.permute.xlu0 (!%p509_p6), %v861_v33 }
 0x180   : > { %v257_v16 = vpop.permute.xlu0 %256 }
 0x181   : > { %v259_v17 = vsub.f32 %v242_v2, %v257_v16 }
 0x183   : > { %v260_v18 = vmul.f32 1.442695, %v259_v17 }
 0x185   : > { %655 = vpow2.f32 %v260_v18 }
 0x186   : > { %657 = vpow2.f32 %v252_v20 }
 0x18f   : > { %v656_v19 = vpop.eup %655 }
 0x190   : > { %264 = vadd.xlane.f32.xlu1 %v656_v19  ;;  %528 = vmatmul.mubr.f32.vlgmr.msra.gmra.mrb[0].mxu0 %v656_v19  ;;  %v658_v21 = vpop.eup %657 }
 0x191   : > { %v263_v23 = vmul.f32 %v658_v21, %v262_v22 }
 0x1a1   : > { %343 = vperm.xlu1 %654, %v658_v21  }
 0x21d   : > { %v265_v24 = vpop.xlane.xlu1 %264 }
 0x21e   : > { %v266_v25 = vadd.f32 %v265_v24, %v263_v23 }
 0x220   : > { %268 = vst.msk [vmem:[#allocation3] sm:$0xff] %vm267_vm2, %v266_v25 }
 0x221   : > { %v344_v27 = vpop.permute.xlu1 %343 }
 0x222   : > { %v346_v28 = vmul.f32 %v344_v27, %v340_v26 }
 0x227   : > { %v354_v32 = vld [vmem:[#allocation3] sm:$0xff] (!%p509_p6) }
 0x228   : > { %660 = vrcp.f32 (!%p509_p6), %v354_v32 }
 0x232   : > { %v661_v34 = vpop.eup (!%p509_p6), %660 }
 0x233   : > { %360 = vperm.xlu0 (!%p509_p6), %659, %v661_v34  }
 0x260   : > { %353 = sbr.rel (%p509_p6) target bundleno = 694 (0x2b6), region = 44 }
 0x263   : > { %v336_v29 = vpop.f32.mrb[0].mxu0 }
 0x264   : > { %v347_v30 = vadd.f32 %v346_v28, %v336_v29  ;;  %v529_v31 = vpop.f32.mrb[1].mxu0 }
 0x266   : > { %349 = vst.msk [vmem:[#allocation4] sm:$0xff] %vm348_vm4, %v347_v30 }
 0x26d   : > { %v357_v35 = vld [vmem:[#allocation4] sm:$0xff] }
 0x2b2   : > { %v361_v36 = vpop.permute.xlu0 %360 }
 0x2b3   : > { %v363_v37 = vmul.f32 %v361_v36, %v357_v35 }
 0x2b5   : > { %364 = vst.msk [vmem:[%s231_s25] sm:$0xff] %vm348_vm4, %v363_v37 }
 0x2b6 PF: > { %s511_s28 = sshll.u32 %s836_s16, 7  ;;  %s380_s30 = sshll.u32 %s231_s25, 4  ;;  %s381_s30 = int_to_ptr.vmem [resolvable:$true] %s380_s30 }
 0x2b7   : > { %s1099_s27 = scalar_lea.hbm %s1161_s2, %s511_s28  ;;  %s366_s20 = scalar_lea.sflag [#allocation7], %s229_s5 }
 0x2b8   : > { %s722_s29 = scalar_lea.vmem %s381_s30, 128  ;;  %p1179_p1 = scmp.ne.s32.totalorder %s1171_s3, 0 }
 0x2b9   : > { %p723_p12 = scmp.ne.s32.totalorder %s381_s30, %s722_s29  ;;  %s862_s0 = smov [#allocation10]  }
 0x2ba   : > { %s726_s22 = sshll.u32 %s862_s0, 4  ;;  %s727_s22 = int_to_ptr.vmem [resolvable:$false] %s726_s22 }
 0x2bb   : > { %p724_p10 = pnand %p723_p12, %p1179_p1  ;;  %s728_s8 = scalar_lea.vmem %s727_s22, 256 }
 0x2bc   : > { %p729_p9 = scmp.lt.s32.totalorder %s381_s30, %s727_s22  ;;  %p730_p13 = scmp.lt.s32.totalorder %s728_s8, %s722_s29 }
 0x2bd   : > { %p725_p11 = pneg %p724_p10 }
 0x2be   : > { %p731_p2 = por %p730_p13, %p729_p9 }
 0x2c0   : > { %p732_p0 = pnand %p731_p2, %p725_p11 }
 0x2c2   : > { %735 = shalt.err (!%p732_p0)
}
 0x2c3   : > { %s736_s16 = scalar_lea.hbm %s1099_s27, 128  ;;  %s740_s12 = scalar_lea.hbm %s1161_s2, 256 }
 0x2c4   : > { %p737_p5 = scmp.ne.s32.totalorder %s1099_s27, %s736_s16  ;;  %p741_p7 = scmp.lt.u32.totalorder %s1099_s27, %s1161_s2 }
 0x2c5   : > { %p742_p4 = scmp.lt.u32.totalorder %s740_s12, %s736_s16  ;;  %p744_p12 = scmp.lt.u32.totalorder %s736_s16, %s1099_s27 }
 0x2c6   : > { %p738_p8 = pnand %p737_p5, %p1179_p1 }
 0x2c7   : > { %p743_p6 = por %p742_p4, %p741_p7 }
 0x2c8   : > { %p739_p3 = pneg %p738_p8 }
 0x2c9   : > { %p745_p10 = por %p744_p12, %p743_p6 }
 0x2cb   : > { %p746_p11 = pnand %p745_p10, %p739_p3 }
 0x2cd   : > { %749 = shalt.err (!%p746_p11)
}
 0x2ce   : > { %540 = dma.vmem_to_hbm [thread:$0]  (%p1179_p1), %s381_s30, 128, %s1099_s27, %s366_s20  }
 0x2cf PF: > { %p554_p9 = scmp.ge.s32.totalorder %s848_s19, 2  ;;  %s392_s7 = sand.u32 1, %s808_s9  }
 0x2d0   : > { %p1180_p13 = scmp.ne.s32.totalorder %s1173_s6, 0  ;;  %s393_s25 = scalar_lea.sflag [#allocation7], %s392_s7 }
 0x2d2   : > { %p550_p2 = pnand %p554_p9, %p1180_p13 }
 0x2d4   : > { %803 = dma.done.wait (!%p550_p2), %s393_s25, 128  }
 0x2d5   : > { %805 = vsyncadd (!%p550_p2), %s393_s25, 4294967168  ;;  %s21_s19 = sadd.s32 1, %s848_s19   ;;  %s1181_s3 = sld [smem:[#allocation16_spill]] }
 0x2d6   : > { %p18_p0 = scmp.ge.s32.totalorder %s21_s19, 6   ;;  %s1182_s28 = sld [smem:[#allocation14_spill]] }
 0x2d7   : > { %s1183_s24 = sld [smem:[#allocation15_spill]]  ;;  %s1184_s9 = smov %s812_s10 }
 0x2d8   : > { %s1185_s10 = smov %s816_s11  ;;  %s1186_s11 = smov %s965_s4 }
 0x2d9   : > { %s1187_s12 = smov %s824_s13  ;;  %s1188_s13 = smov %s828_s14 }
 0x2da   : > { %s1190_s15 = smov %s840_s17  ;;  %s1191_s16 = smov %s844_s18 }
 0x2db   : > { %s1189_s14 = smov %s1181_s3  ;;  %20 = sbr.rel (!%p18_p0) target bundleno = 13 (0xd), region = 94 }
 0x2dc   : > { %s1192_s17 = smov %s1182_s28 }
 0x2dd   : > { %s1193_s18 = smov %s1183_s24 }
 0x2e2   :  { %398 = vsyncpa [#allocation6], 1 }
 0x2e3   :  { %400 = vsyncpa [#allocation6 + $0x1], 1 }
 0x2e4   :  { %401 = vsyncpa [#allocation9], 1 }
 0x2e5   :  { %403 = vsyncpa [#allocation9 + $0x1], 1 }
 0x2e6   :  { %404 = vsyncpa [#allocation7], 1 }
 0x2e7   :  { %406 = vsyncpa [#allocation7 + $0x1], 1 }

</bundles_post_ra>
